<compile_context>
chip_gen: v7x
topology: tpu7x:2x2x1
jax: 0.10.0
libtpu: 0.0.40
codegen_flags: <defaults>
</compile_context>

<pallas_src>
import jax
import jax.numpy as jnp
from jax.experimental import pallas as pl
from jax.experimental.pallas import tpu as pltpu

LANES = 128
MAX_BLOCK_ROWS = 2048  # (2048,128) f32 = 1 MiB/block; 3 inputs x 2 buffers ~= 6 MiB VMEM


def _round_up(x, m):
    return (x + m - 1) // m * m


def _make_kernel(block_rows, valid_rows, ragged):
    """Kernel: partial-sum one (block_rows, 128) tile into an (8, 128) output block."""

    def kernel(mask_ref, x_ref, y_ref, part_ref):
        x = x_ref[...].astype(jnp.float32)
        y = y_ref[...].astype(jnp.float32)
        m = mask_ref[...].astype(jnp.float32)
        diff = x - y
        val = m * (diff * diff)

        if ragged:
            # Last block extends past the array: zero out-of-range rows.
            row0 = pl.program_id(0) * block_rows
            ridx = jax.lax.broadcasted_iota(jnp.int32, (block_rows, LANES), 0)
            val = jnp.where((row0 + ridx) < valid_rows, val, 0.0)

        # (block_rows, 128) -> (block_rows//8, 8, 128) -> sum over leading dim:
        # pure VPU vreg adds; the cross-lane/sublane reduce is deferred to the host side.
        part_ref[...] = val.reshape(block_rows // 8, 8, LANES).sum(axis=0)

    return kernel


def masked_mse_loss(mask, inp, target):
    """mean(mask * (inp - target)^2), all tensors broadcast-compatible."""
    shape = jnp.broadcast_shapes(mask.shape, inp.shape, target.shape)
    n_elem = 1
    for s in shape:
        n_elem *= s

    def flat(a):
        # Only materialize a broadcast copy if the shape actually differs.
        if a.shape != shape:
            a = jnp.broadcast_to(a, shape)
        return a.reshape(-1)

    mask_f, inp_f, tgt_f = flat(mask), flat(inp), flat(target)

    # Pad only if the element count is not lane-aligned (rare); padded mask
    # entries are zero so they contribute nothing to the sum.
    padded = _round_up(n_elem, LANES)
    if padded != n_elem:
        pad = padded - n_elem
        mask_f = jnp.pad(mask_f, (0, pad))
        inp_f = jnp.pad(inp_f, (0, pad))
        tgt_f = jnp.pad(tgt_f, (0, pad))

    rows = padded // LANES
    mask_2d = mask_f.reshape(rows, LANES)
    inp_2d = inp_f.reshape(rows, LANES)
    tgt_2d = tgt_f.reshape(rows, LANES)

    block_rows = min(MAX_BLOCK_ROWS, _round_up(rows, 8))
    nblocks = pl.cdiv(rows, block_rows)
    ragged = (rows % block_rows) != 0

    in_spec = pl.BlockSpec((block_rows, LANES), lambda i: (i, 0))
    out_spec = pl.BlockSpec((8, LANES), lambda i: (i, 0))

    partials = pl.pallas_call(
        _make_kernel(block_rows, rows, ragged),
        out_shape=jax.ShapeDtypeStruct((nblocks * 8, LANES), jnp.float32),
        grid_spec=pltpu.PrefetchScalarGridSpec(
            num_scalar_prefetch=0,
            grid=(nblocks,),
            in_specs=[in_spec, in_spec, in_spec],
            out_specs=out_spec,
        ),
        compiler_params=pltpu.CompilerParams(
            dimension_semantics=("parallel",)),
    )(mask_2d, inp_2d, tgt_2d)

    # Tiny final reduction (nblocks*8 x 128 elements) + divide by true count.
    total = jnp.sum(partials, dtype=jnp.float32)
    return (total / jnp.float32(n_elem)).astype(jnp.float32)


if __name__ == "__main__":
    key = jax.random.PRNGKey(0)
    k1, k2, k3 = jax.random.split(key, 3)

    B, C, H, W = 2, 4, 16, 16  # layout: NCHW, like the PyTorch module
    inp = jax.random.normal(k1, (B, C, H, W), dtype=jnp.float32)
    target = jax.random.normal(k2, (B, C, H, W), dtype=jnp.float32)
    # Deterministic binary mask (plays the role of the module's __init__ arg).
    mask = (jax.random.uniform(k3, (B, C, H, W)) > 0.5).astype(jnp.float32)

    out = masked_mse_loss(mask, inp, target)
    out = jax.block_until_ready(out)

    # Reference check in plain JAX.
    ref = jnp.mean(mask * (inp - target) ** 2)
    assert jnp.allclose(out, ref, rtol=1e-5, atol=1e-6), (out, ref)

    print("KERNEL_OK")
</pallas_src>

<mosaic_0001>
module attributes {stable_mosaic.version = 11 : i64} {
  func.func @kernel(%arg0: i32, %arg1: memref<16x128xf32, #tpu.memory_space<vmem>>, %arg2: memref<16x128xf32, #tpu.memory_space<vmem>>, %arg3: memref<16x128xf32, #tpu.memory_space<vmem>>, %arg4: memref<8x128xf32, #tpu.memory_space<vmem>>) attributes {dimension_semantics = [#tpu.dimension_semantics<parallel>], iteration_bounds = array<i64: 1>, scalar_prefetch = 0 : i64, scratch_operands = 0 : i64, tpu.core_type = #tpu.core_type<tc>, window_params = [{transform_indices = @transform_0, window_bounds = array<i64: 16, 128>}, {transform_indices = @transform_1, window_bounds = array<i64: 16, 128>}, {transform_indices = @transform_2, window_bounds = array<i64: 16, 128>}, {transform_indices = @transform_3, window_bounds = array<i64: 8, 128>}]} {
    %c0 = arith.constant 0 : index
    %c0_0 = arith.constant 0 : index
    %0 = vector.load %arg2[%c0, %c0_0] : memref<16x128xf32, #tpu.memory_space<vmem>>, vector<16x128xf32>
    %c0_1 = arith.constant 0 : index
    %c0_2 = arith.constant 0 : index
    %1 = vector.load %arg3[%c0_1, %c0_2] : memref<16x128xf32, #tpu.memory_space<vmem>>, vector<16x128xf32>
    %c0_3 = arith.constant 0 : index
    %c0_4 = arith.constant 0 : index
    %2 = vector.load %arg1[%c0_3, %c0_4] : memref<16x128xf32, #tpu.memory_space<vmem>>, vector<16x128xf32>
    %3 = arith.subf %0, %1 : vector<16x128xf32>
    %4 = arith.mulf %3, %3 : vector<16x128xf32>
    %5 = arith.mulf %2, %4 : vector<16x128xf32>
    %6 = vector.shape_cast %5 : vector<16x128xf32> to vector<2x8x128xf32>
    %cst = arith.constant dense<0.000000e+00> : vector<8x128xf32>
    %7 = vector.multi_reduction <add>, %6, %cst [0] : vector<2x8x128xf32> to vector<8x128xf32>
    %c0_5 = arith.constant 0 : index
    %c0_6 = arith.constant 0 : index
    %8 = vector.load %arg4[%c0_5, %c0_6] : memref<8x128xf32, #tpu.memory_space<vmem>>, vector<8x128xf32>
    tpu.vector_store %arg4[%c0_5, %c0_6], %7 {strides = array<i32>} : memref<8x128xf32, #tpu.memory_space<vmem>>, vector<8x128xf32>,
    return
  }
  func.func @transform_0(%arg0: i32) -> (i32, i32) {
    %c0_i32 = arith.constant 0 : i32
    %c0_i32_0 = arith.constant 0 : i32
    return %arg0, %c0_i32 : i32, i32
  }
  func.func @transform_1(%arg0: i32) -> (i32, i32) {
    %c0_i32 = arith.constant 0 : i32
    %c0_i32_0 = arith.constant 0 : i32
    return %arg0, %c0_i32 : i32, i32
  }
  func.func @transform_2(%arg0: i32) -> (i32, i32) {
    %c0_i32 = arith.constant 0 : i32
    %c0_i32_0 = arith.constant 0 : i32
    return %arg0, %c0_i32 : i32, i32
  }
  func.func @transform_3(%arg0: i32) -> (i32, i32) {
    %c0_i32 = arith.constant 0 : i32
    %c0_i32_0 = arith.constant 0 : i32
    return %arg0, %c0_i32 : i32, i32
  }
}

</mosaic_0001>

<bundles_post_ra>
// kernel: tpu_custom_call.1
= control target key start
LH: loop header
LB: loop body
LE: loop exit
PB: predicated region body
PF: predicated region fallthrough
CT: control target
= control target key end

     0   :  { %8 = vsyncpa [#allocation3], 0  ;;  %s276_s0 = inlined_call_operand.hbm [shape: f32[16,128], index: 0, kind: input, shape index: {}]   ;;  %s277_s1 = inlined_call_operand.hbm [shape: f32[16,128], index: 1, kind: input, shape index: {}]   ;;  %s278_s2 = inlined_call_operand.hbm [shape: f32[16,128], index: 2, kind: input, shape index: {}]   ;;  %s279_s3 = inlined_call_operand.hbm [shape: f32[8,128], index: 3, kind: output, shape index: {}]  }
   0x1   :  { %9 = vsyncpa [#allocation6], 0 }
   0x2   :  { %10 = vsyncpa [#allocation4], 0  ;;  %s186_s12 = smov [#allocation5]   ;;  %s187_s14 = smov [#allocation2]  }
   0x3   :  { %s28_s13 = sshll.u32 %s186_s12, 4  ;;  %s16_s15 = sshll.u32 %s187_s14, 4  ;;  %s29_s13 = int_to_ptr.vmem [resolvable:$true] %s28_s13  ;;  %s212_s15 = int_to_ptr.vmem [resolvable:$true] %s16_s15 }
   0x4   :  { %s92_s18 = scalar_lea.hbm %s277_s1, 256 }
   0x5   :  { %p93_p0 = scmp.ne.s32.totalorder %s277_s1, %s92_s18  ;;  %p96_p1 = scmp.lt.u32.totalorder %s92_s18, %s277_s1 }
   0x7   :  { %p98_p2 = pnand %p96_p1, %p93_p0 }
   0x9   :  { %101 = shalt.err (!%p98_p2)
}
   0xa   :  { %s102_s23 = scalar_lea.vmem %s29_s13, 256  ;;  %p107_p4 = scmp.lt.s32.totalorder %s29_s13, %s29_s13 }
   0xb   :  { %p103_p3 = scmp.ne.s32.totalorder %s29_s13, %s102_s23  ;;  %p108_p5 = scmp.lt.s32.totalorder %s102_s23, %s102_s23 }
   0xd   :  { %p109_p6 = por %p108_p5, %p107_p4 }
   0xf   :  { %p110_p7 = pnand %p109_p6, %p103_p3 }
  0x11   :  { %113 = shalt.err (!%p110_p7)
}
  0x12   :  { %s188_s24 = smov 128   ;;  %s189_s25 = smov 8  }
  0x13   :  { %34 = dma.hbm_to_vmem [thread:$0]  %s277_s1, 256, %s29_s13, [#allocation6], %s188_s24, %s188_s24, %s189_s25  }
  0x14   :  { %s114_s30 = scalar_lea.hbm %s276_s0, 256 }
  0x15   :  { %p115_p8 = scmp.ne.s32.totalorder %s276_s0, %s114_s30  ;;  %p118_p9 = scmp.lt.u32.totalorder %s114_s30, %s276_s0 }
  0x17   :  { %p120_p10 = pnand %p118_p9, %p115_p8 }
  0x19   :  { %123 = shalt.err (!%p120_p10)
}
  0x1a   :  { %s124_s8 = scalar_lea.vmem %s212_s15, 256  ;;  %p129_p12 = scmp.lt.s32.totalorder %s212_s15, %s212_s15 }
  0x1b   :  { %p125_p11 = scmp.ne.s32.totalorder %s212_s15, %s124_s8  ;;  %p130_p13 = scmp.lt.s32.totalorder %s124_s8, %s124_s8 }
  0x1d   :  { %p131_p0 = por %p130_p13, %p129_p12 }
  0x1f   :  { %p132_p1 = pnand %p131_p0, %p125_p11 }
  0x21   :  { %135 = shalt.err (!%p132_p1)
}
  0x22   :  { %22 = dma.hbm_to_vmem [thread:$0]  %s276_s0, 256, %s212_s15, [#allocation3], %s188_s24, %s188_s24, %s189_s25  }
  0x23   :  { %s190_s10 = smov [#allocation7]   ;;  %s136_s14 = scalar_lea.hbm %s278_s2, 256 }
  0x24   :  { %s40_s11 = sshll.u32 %s190_s10, 4  ;;  %p137_p2 = scmp.ne.s32.totalorder %s278_s2, %s136_s14  ;;  %s41_s11 = int_to_ptr.vmem [resolvable:$true] %s40_s11 }
  0x25   :  { %p140_p3 = scmp.lt.u32.totalorder %s136_s14, %s278_s2 }
  0x27   :  { %p142_p4 = pnand %p140_p3, %p137_p2 }
  0x29   :  { %145 = shalt.err (!%p142_p4)
}
  0x2a   :  { %s146_s20 = scalar_lea.vmem %s41_s11, 256  ;;  %p151_p6 = scmp.lt.s32.totalorder %s41_s11, %s41_s11 }
  0x2b   :  { %p147_p5 = scmp.ne.s32.totalorder %s41_s11, %s146_s20  ;;  %p152_p7 = scmp.lt.s32.totalorder %s146_s20, %s146_s20 }
  0x2d   :  { %p153_p8 = por %p152_p7, %p151_p6 }
  0x2f   :  { %p154_p9 = pnand %p153_p8, %p147_p5 }
  0x31   :  { %157 = shalt.err (!%p154_p9)
}
  0x32   :  { %46 = dma.hbm_to_vmem [thread:$0]  %s278_s2, 256, %s41_s11, [#allocation6], %s188_s24, %s188_s24, %s189_s25  }
  0x33   :  { %180 = dma.done.wait [#allocation3], 256  }
  0x34   :  { %181 = vsyncadd [#allocation3], 4294967040 }
  0x35   :  { %182 = dma.done.wait [#allocation6], 512  }
  0x36   :  { %183 = vsyncadd [#allocation6], 4294966784  ;;  %v56_v0 = vld [vmem:[#allocation5] sm:$0xff]  ;;  %v57_v1 = vld [vmem:[#allocation5 + $0x8] sm:$0xff]  ;;  %s191_s21 = smov [#allocation8]  }
  0x37   :  { %v58_v2 = vld [vmem:[#allocation7] sm:$0xff]  ;;  %v59_v3 = vld [vmem:[#allocation7 + $0x8] sm:$0xff]  ;;  %s76_s22 = sshll.u32 %s191_s21, 4  ;;  %s77_s22 = int_to_ptr.vmem [resolvable:$true] %s76_s22 }
  0x38   :  { %v62_v4 = vsub.f32 %v56_v0, %v58_v2  ;;  %v60_v5 = vld [vmem:[#allocation2] sm:$0xff]  ;;  %v63_v6 = vsub.f32 %v57_v1, %v59_v3  ;;  %v61_v7 = vld [vmem:[#allocation2 + $0x8] sm:$0xff]  ;;  %s158_s2 = scalar_lea.vmem %s77_s22, 128  ;;  %p163_p11 = scmp.lt.s32.totalorder %s77_s22, %s77_s22 }
  0x39   :  { %p159_p10 = scmp.ne.s32.totalorder %s77_s22, %s158_s2  ;;  %p164_p12 = scmp.lt.s32.totalorder %s158_s2, %s158_s2 }
  0x3a   :  { %v64_v8 = vmul.f32 %v62_v4, %v62_v4  ;;  %v65_v9 = vmul.f32 %v63_v6, %v63_v6 }
  0x3b   :  { %p165_p13 = por %p164_p12, %p163_p11 }
  0x3c   :  { %v66_v10 = vmul.f32 %v64_v8, %v60_v5  ;;  %v67_v11 = vmul.f32 %v65_v9, %v61_v7 }
  0x3d   :  { %p166_p0 = pnand %p165_p13, %p159_p10 }
  0x3e   :  { %v68_v12 = vadd.f32 %v67_v11, %v66_v10 }
  0x40   :  { %69 = vst [vmem:[#allocation8] sm:$0xff] %v68_v12 }
  0x41   :  { %169 = shalt.err (!%p166_p0)
}
  0x42   :  { %s170_s25 = scalar_lea.hbm %s279_s3, 128 }
  0x43   :  { %p171_p1 = scmp.ne.s32.totalorder %s279_s3, %s170_s25  ;;  %p174_p2 = scmp.lt.u32.totalorder %s170_s25, %s279_s3 }
  0x45   :  { %p176_p3 = pnand %p174_p2, %p171_p1 }
  0x47   :  { %179 = shalt.err (!%p176_p3)
}
  0x48   :  { %79 = dma.vmem_to_hbm [thread:$0]  %s77_s22, 128, %s279_s3, [#allocation4]  }
  0x49   :  { %184 = dma.done.wait [#allocation4], 128  }
  0x4a   :  { %185 = vsyncadd [#allocation4], 4294967168 }
  0x4b   :  { %83 = vsyncpa [#allocation3], 1 }
  0x4c   :  { %84 = vsyncpa [#allocation6], 1 }
  0x4d   :  { %85 = vsyncpa [#allocation4], 1 }

</bundles_post_ra>
